<compile_context>
chip_gen: v6e
topology: v6e:2x2x1
jax: 0.10.0
libtpu: 0.0.40
codegen_flags: <defaults>
</compile_context>

<pallas_src>
import functools
import math

import jax
import jax.numpy as jnp
from jax import lax
from jax.experimental import pallas as pl
from jax.experimental.pallas import tpu as pltpu

_VMEM_LIMIT = 40 * 1024 * 1024          # > v5e/v6e scoped defaults, headroom on v7x (64 MiB phys)
_DEFAULT_TILE_BYTES = 4 * 1024 * 1024   # streaming-pass tile size (per x tile buffer)
_DEFAULT_FUSE_BYTES = 4 * 1024 * 1024   # x at/below this size -> single fused kernel


# ----------------------------- parameter packing (host) -----------------------------

def _pack_params(w1, b1, w2, b2, F):
    """Pack fc1/fc2 weights + biases (PyTorch Linear layout) into ONE lane-tiled f32 array.

    Layout (S = H rounded up to 8, CP = F*C):
      rows [0,   H)     fc1.weight    (H, C) tiled F times along lanes
      rows [S,   S+H)   fc2.weight.T  (H, C) tiled F times along lanes
      rows [2S, 2S+H)   fc1.bias broadcast across all CP lanes
      row   3S          fc2.bias      (C,)   tiled F times along lanes
    Sections start at multiples of 8 rows so in-kernel slices are sublane-aligned.
    """
    H, C = w1.shape
    S = ((H + 7) // 8) * 8
    CP = C * F
    f32 = jnp.float32
    w1p = jnp.tile(w1.astype(f32), (1, F))                      # (H, CP)
    w2p = jnp.tile(w2.T.astype(f32), (1, F))                    # (H, CP)
    b1p = jnp.broadcast_to(b1.astype(f32)[:, None], (H, CP))    # (H, CP)
    b2p = jnp.tile(b2.astype(f32)[None, :], (1, F))             # (1, CP)

    def pad_rows(a, rows):
        return jnp.concatenate([a, jnp.zeros((rows - a.shape[0], CP), f32)], axis=0)

    return jnp.concatenate(
        [pad_rows(w1p, S), pad_rows(w2p, S), pad_rows(b1p, S), pad_rows(b2p, 8)], axis=0)


# -------------------------------- in-kernel SE MLP ----------------------------------

def _se_mlp_gate(chan_sum, p, *, L, S, H):
    """chan_sum: (1, CP) packed per-channel sums (lane blocks are partial sums whose
    full-lane reduce equals the total channel sum).  Returns the f32 sigmoid gate,
    lane-tiled (1, CP) to match the packed x layout.  All VPU/XLU, no MXU."""
    w1p = p[0:H, :]                 # fc1.weight, lane-tiled      (H, CP)
    w2p = p[S:S + H, :]             # fc2.weight^T, lane-tiled    (H, CP)
    b1b = p[2 * S:2 * S + H, :]     # fc1.bias bcast over lanes   (H, CP)
    b2p = p[3 * S:3 * S + 1, :]     # fc2.bias, lane-tiled        (1, CP)

    # fc1: full-lane reduce of (sum * w1) == mean(x) @ w1.T once scaled by 1/L.
    h = jnp.sum(chan_sum * w1p, axis=-1, keepdims=True) * (1.0 / L) + b1b   # (H, CP)
    h = jnp.maximum(h, 0.0)                                                 # ReLU
    g = jnp.sum(h * w2p, axis=0, keepdims=True) + b2p                       # (1, CP)
    return jax.nn.sigmoid(g)                                                # f32 gate


# ------------------------------------ kernels ---------------------------------------

def _se_fused_kernel(x_ref, p_ref, o_ref, *, L, S, H):
    """Whole-array fused path: sum -> MLP -> sigmoid -> gate multiply in one body."""
    x = x_ref[...]
    chan_sum = jnp.sum(x.astype(jnp.float32), axis=0, keepdims=True)        # (1, CP)
    g = _se_mlp_gate(chan_sum, p_ref[...], L=L, S=S, H=H)                   # f32 gate
    o_ref[...] = (x * g).astype(o_ref.dtype)


def _se_reduce_kernel(x_ref, p_ref, g_ref, acc_ref, *, L, Lp, TL, S, H):
    """Pass A: accumulate packed per-channel sums; on the last tile run the SE MLP."""
    i = pl.program_id(0)
    last = pl.num_programs(0) - 1

    @pl.when(i == 0)
    def _init():
        acc_ref[...] = jnp.zeros_like(acc_ref)

    if Lp % TL == 0:
        # Even tiling: no masking code emitted at all.
        acc_ref[...] += jnp.sum(x_ref[...].astype(jnp.float32), axis=0, keepdims=True)
    else:
        # Masking only on the last (partial) tile.
        @pl.when(i < last)
        def _full_tile():
            acc_ref[...] += jnp.sum(x_ref[...].astype(jnp.float32), axis=0, keepdims=True)

        @pl.when(i == last)
        def _masked_tile():
            xb = x_ref[...].astype(jnp.float32)
            row = lax.broadcasted_iota(jnp.int32, xb.shape, 0) + i * TL
            xb = jnp.where(row < Lp, xb, 0.0)
            acc_ref[...] += jnp.sum(xb, axis=0, keepdims=True)

    @pl.when(i == last)
    def _finalize():
        g_ref[...] = _se_mlp_gate(acc_ref[...], p_ref[...], L=L, S=S, H=H)


def _se_gate_kernel(x_ref, g_ref, o_ref):
    """Pass B: streaming gate multiply.  Gate is f32; only the product is cast back."""
    o_ref[...] = (x_ref[...] * g_ref[...]).astype(o_ref.dtype)


# ------------------------------------ wrapper ---------------------------------------

def _lane_pack_factor(L, C):
    """F such that CP = F*C = lcm(C, 128) is lane-dense, if the row count allows it."""
    F = 128 // math.gcd(C, 128)
    return F if (F > 1 and L % F == 0) else 1


def _choose_tile_rows(Lp, CP, itemsize, tile_bytes):
    """Rows per tile: ~tile_bytes per x buffer, multiple of 8.  Prefer an exact divisor
    of Lp, but never accept a degenerate one -- fall back to an uneven last tile."""
    target = max(8, (tile_bytes // (CP * itemsize)) // 8 * 8)
    if Lp <= target:
        return Lp                               # single block (block dim == full dim)
    for tl in range(target, 7, -8):
        if Lp % tl == 0 and tl >= max(8, target // 2):
            return tl                           # good exact divisor -> even tiling
    return target                               # uneven last tile (masked in pass A)


def se_layer(x, w1, b1, w2, b2, *,
             tile_bytes=_DEFAULT_TILE_BYTES, fuse_bytes_limit=_DEFAULT_FUSE_BYTES):
    """SELayer forward.  x: (L, C), contiguous row-major (the lane-packing reshape is
    only free for contiguous inputs).  Params in PyTorch Linear layout:
      w1 = fc1.weight (H, C), b1 = fc1.bias (H,), w2 = fc2.weight (C, H), b2 = fc2.bias (C,)."""
    L, C = x.shape
    H = w1.shape[0]
    assert w1.shape == (H, C) and b1.shape == (H,)
    assert w2.shape == (C, H) and b2.shape == (C,)

    # Lane-dense packing: view x as (L/F, CP) with CP = lcm(C, 128) when possible.
    F = _lane_pack_factor(L, C)
    CP, Lp = C * F, L // F
    x_p = x.reshape(Lp, CP)                        # free row-major reshape
    params = _pack_params(w1, b1, w2, b2, F)       # single small f32 operand
    S = ((H + 7) // 8) * 8
    PR = 3 * S + 8

    itemsize = jnp.dtype(x.dtype).itemsize
    x_bytes = L * C * itemsize

    if x_bytes <= fuse_bytes_limit:
        # Fused single-invocation path: one HBM read + one write, one launch.
        out_p = pl.pallas_call(
            functools.partial(_se_fused_kernel, L=L, S=S, H=H),
            out_shape=jax.ShapeDtypeStruct((Lp, CP), x.dtype),
            grid=(1,),
            in_specs=[
                pl.BlockSpec((Lp, CP), lambda i: (0, 0)),
                pl.BlockSpec((PR, CP), lambda i: (0, 0)),
            ],
            out_specs=pl.BlockSpec((Lp, CP), lambda i: (0, 0)),
            compiler_params=pltpu.CompilerParams(
                dimension_semantics=("arbitrary",),
                vmem_limit_bytes=_VMEM_LIMIT),
        )(x_p, params)
        return out_p.reshape(L, C)

    # Tiled two-pass path for x larger than the fused VMEM budget.
    TL = _choose_tile_rows(Lp, CP, itemsize, tile_bytes)
    ntiles = pl.cdiv(Lp, TL)

    # Pass A: channel-sum reduction + tiny SE MLP -> lane-tiled f32 gate (1, CP).
    gate = pl.pallas_call(
        functools.partial(_se_reduce_kernel, L=L, Lp=Lp, TL=TL, S=S, H=H),
        out_shape=jax.ShapeDtypeStruct((1, CP), jnp.float32),
        grid=(ntiles,),
        in_specs=[
            pl.BlockSpec((TL, CP), lambda i: (i, 0)),
            pl.BlockSpec((PR, CP), lambda i: (0, 0)),
        ],
        out_specs=pl.BlockSpec((1, CP), lambda i: (0, 0)),
        scratch_shapes=[pltpu.VMEM((1, CP), jnp.float32)],
        compiler_params=pltpu.CompilerParams(
            dimension_semantics=("arbitrary",),
            vmem_limit_bytes=_VMEM_LIMIT),
    )(x_p, params)
    # TODO(synk): on v7x, split pass A across both TensorCores (leading "parallel" grid
    # axis of 2 producing (2, CP) partial sums, finalize outside); single TC on v5e/v6e.

    # Pass B: memory-bound gating; row-tile axis is "parallel" (megacore on v7x).
    out_p = pl.pallas_call(
        _se_gate_kernel,
        out_shape=jax.ShapeDtypeStruct((Lp, CP), x.dtype),
        grid=(ntiles,),
        in_specs=[
            pl.BlockSpec((TL, CP), lambda i: (i, 0)),
            pl.BlockSpec((1, CP), lambda i: (0, 0)),
        ],
        out_specs=pl.BlockSpec((TL, CP), lambda i: (i, 0)),
        compiler_params=pltpu.CompilerParams(
            dimension_semantics=("parallel",),
            vmem_limit_bytes=_VMEM_LIMIT),
    )(x_p, gate)

    return out_p.reshape(L, C)


# --------------------------------- init & reference ---------------------------------

def init_params(key, channel, reduction):
    """Deterministic PyTorch-Linear-style init (uniform +/- 1/sqrt(fan_in)), torch layout."""
    hidden = max(1, channel // reduction)
    k1, k2, k3, k4 = jax.random.split(key, 4)
    bnd1 = 1.0 / (channel ** 0.5)
    bnd2 = 1.0 / (hidden ** 0.5)
    w1 = jax.random.uniform(k1, (hidden, channel), jnp.float32, -bnd1, bnd1)  # fc1.weight
    b1 = jax.random.uniform(k2, (hidden,),         jnp.float32, -bnd1, bnd1)  # fc1.bias
    w2 = jax.random.uniform(k3, (channel, hidden), jnp.float32, -bnd2, bnd2)  # fc2.weight
    b2 = jax.random.uniform(k4, (channel,),        jnp.float32, -bnd2, bnd2)  # fc2.bias
    return w1, b1, w2, b2


def _se_reference(x, w1, b1, w2, b2):
    y = jnp.mean(x.astype(jnp.float32), axis=0)
    y = jnp.maximum(y @ w1.T + b1, 0.0)
    y = jax.nn.sigmoid(y @ w2.T + b2)
    return (x.astype(jnp.float32) * y[None, :]).astype(x.dtype)


if __name__ == "__main__":
    key = jax.random.PRNGKey(0)

    # (L, C, reduction, dtype, tile_bytes, fuse_bytes_limit)
    cases = [
        (8,    32, 16, jnp.float32, _DEFAULT_TILE_BYTES, _DEFAULT_FUSE_BYTES),  # fused, F=4 (CP=128)
        (4096, 32, 16, jnp.float32, _DEFAULT_TILE_BYTES, _DEFAULT_FUSE_BYTES),  # fused, F=4
        (512,  48,  8, jnp.float32, _DEFAULT_TILE_BYTES, _DEFAULT_FUSE_BYTES),  # fused, lcm packing F=8 (CP=384)
        (4096, 32, 16, jnp.float32, 64 * 1024, 0),                               # forced tiled path, even tiles
        (1000, 48,  8, jnp.float32, 64 * 1024, 0),                               # forced tiled path, uneven last tile
        (2048, 64, 16, jnp.bfloat16, _DEFAULT_TILE_BYTES, _DEFAULT_FUSE_BYTES),  # bf16 fused, F=2
    ]

    for idx, (L, C, red, dtype, tb, fb) in enumerate(cases):
        kx, kp, key = jax.random.split(key, 3)
        x = jax.random.normal(kx, (L, C), dtype=jnp.float32).astype(dtype)
        w1, b1, w2, b2 = init_params(kp, C, red)

        out = jax.block_until_ready(
            se_layer(x, w1, b1, w2, b2, tile_bytes=tb, fuse_bytes_limit=fb))
        ref = _se_reference(x, w1, b1, w2, b2)
        assert out.shape == ref.shape and out.dtype == ref.dtype, f"case {idx}: shape/dtype mismatch"
        tol = 1e-5 if dtype == jnp.float32 else 2e-2
        assert jnp.allclose(out.astype(jnp.float32), ref.astype(jnp.float32),
                            atol=tol, rtol=tol), f"case {idx}: value mismatch"

    print("KERNEL_OK")
</pallas_src>

<mosaic_0001>
module attributes {stable_mosaic.version = 11 : i64} {
  func.func @_se_fused_kernel(%arg0: i32, %arg1: memref<2x128xf32, #tpu.memory_space<vmem>>, %arg2: memref<32x128xf32, #tpu.memory_space<vmem>>, %arg3: memref<2x128xf32, #tpu.memory_space<vmem>>) attributes {dimension_semantics = [#tpu.dimension_semantics<arbitrary>], iteration_bounds = array<i64: 1>, scalar_prefetch = 0 : i64, scratch_operands = 0 : i64, tpu.core_type = #tpu.core_type<tc>, window_params = [{pipeline_mode = #tpu.pipeline_mode<synchronous>, transform_indices = @transform_0, window_bounds = array<i64: 2, 128>}, {pipeline_mode = #tpu.pipeline_mode<synchronous>, transform_indices = @transform_1, window_bounds = array<i64: 32, 128>}, {pipeline_mode = #tpu.pipeline_mode<synchronous>, transform_indices = @transform_2, window_bounds = array<i64: 2, 128>}]} {
    %c0 = arith.constant 0 : index
    %c0_0 = arith.constant 0 : index
    %0 = vector.load %arg1[%c0, %c0_0] : memref<2x128xf32, #tpu.memory_space<vmem>>, vector<2x128xf32>
    %cst = arith.constant dense<0.000000e+00> : vector<128xf32>
    %1 = vector.multi_reduction <add>, %0, %cst [0] : vector<2x128xf32> to vector<128xf32>
    %2 = vector.shape_cast %1 : vector<128xf32> to vector<1x128xf32>
    %c0_1 = arith.constant 0 : index
    %c0_2 = arith.constant 0 : index
    %3 = vector.load %arg2[%c0_1, %c0_2] : memref<32x128xf32, #tpu.memory_space<vmem>>, vector<32x128xf32>
    %4 = vector.extract_strided_slice %3 {offsets = [0, 0], sizes = [2, 128], strides = [1, 1]} : vector<32x128xf32> to vector<2x128xf32>
    %5 = vector.extract_strided_slice %3 {offsets = [8, 0], sizes = [2, 128], strides = [1, 1]} : vector<32x128xf32> to vector<2x128xf32>
    %6 = vector.extract_strided_slice %3 {offsets = [16, 0], sizes = [2, 128], strides = [1, 1]} : vector<32x128xf32> to vector<2x128xf32>
    %7 = vector.extract_strided_slice %3 {offsets = [24, 0], sizes = [1, 128], strides = [1, 1]} : vector<32x128xf32> to vector<1x128xf32>
    %8 = vector.broadcast %2 : vector<1x128xf32> to vector<2x128xf32>
    %9 = arith.mulf %8, %4 : vector<2x128xf32>
    %cst_3 = arith.constant dense<0.000000e+00> : vector<2xf32>
    %10 = vector.multi_reduction <add>, %9, %cst_3 [1] : vector<2x128xf32> to vector<2xf32>
    %11 = vector.shape_cast %10 : vector<2xf32> to vector<2x1xf32>
    %cst_4 = arith.constant 1.250000e-01 : f32
    %12 = vector.broadcast %cst_4 : f32 to vector<2x1xf32>
    %13 = arith.mulf %11, %12 : vector<2x1xf32>
    %14 = vector.broadcast %13 : vector<2x1xf32> to vector<2x128xf32>
    %15 = arith.addf %14, %6 : vector<2x128xf32>
    %cst_5 = arith.constant 0.000000e+00 : f32
    %16 = vector.broadcast %cst_5 : f32 to vector<2x128xf32>
    %17 = arith.maximumf %15, %16 : vector<2x128xf32>
    %18 = arith.mulf %17, %5 : vector<2x128xf32>
    %cst_6 = arith.constant dense<0.000000e+00> : vector<128xf32>
    %19 = vector.multi_reduction <add>, %18, %cst_6 [0] : vector<2x128xf32> to vector<128xf32>
    %20 = vector.shape_cast %19 : vector<128xf32> to vector<1x128xf32>
    %21 = arith.addf %20, %7 : vector<1x128xf32>
    %22 = arith.negf %21 : vector<1x128xf32>
    %23 = math.exp %22 : vector<1x128xf32>
    %cst_7 = arith.constant 1.000000e+00 : f32
    %24 = vector.broadcast %cst_7 : f32 to vector<1x128xf32>
    %25 = arith.addf %24, %23 : vector<1x128xf32>
    %26 = arith.divf %24, %25 : vector<1x128xf32>
    %27 = vector.broadcast %26 : vector<1x128xf32> to vector<2x128xf32>
    %28 = arith.mulf %0, %27 : vector<2x128xf32>
    %c0_8 = arith.constant 0 : index
    %c0_9 = arith.constant 0 : index
    %29 = vector.load %arg3[%c0_8, %c0_9] : memref<2x128xf32, #tpu.memory_space<vmem>>, vector<2x128xf32>
    tpu.vector_store %arg3[%c0_8, %c0_9], %28 {strides = array<i32>} : memref<2x128xf32, #tpu.memory_space<vmem>>, vector<2x128xf32>,
    return
  }
  func.func @transform_0(%arg0: i32) -> (i32, i32) {
    %c0_i32 = arith.constant 0 : i32
    %c0_i32_0 = arith.constant 0 : i32
    %c0_i32_1 = arith.constant 0 : i32
    return %c0_i32, %c0_i32_0 : i32, i32
  }
  func.func @transform_1(%arg0: i32) -> (i32, i32) {
    %c0_i32 = arith.constant 0 : i32
    %c0_i32_0 = arith.constant 0 : i32
    %c0_i32_1 = arith.constant 0 : i32
    return %c0_i32, %c0_i32_0 : i32, i32
  }
  func.func @transform_2(%arg0: i32) -> (i32, i32) {
    %c0_i32 = arith.constant 0 : i32
    %c0_i32_0 = arith.constant 0 : i32
    %c0_i32_1 = arith.constant 0 : i32
    return %c0_i32, %c0_i32_0 : i32, i32
  }
}

</mosaic_0001>

<bundles_post_ra>
// kernel: tpu_custom_call.1
= control target key start
LH: loop header
LB: loop body
LE: loop exit
PB: predicated region body
PF: predicated region fallthrough
CT: control target
= control target key end

     0   :  { %7 = vsyncpa [#allocation3], 0  ;;  %s203_s0 = inlined_call_operand.hbm [shape: f32[2,128], index: 0, kind: input, shape index: {}]   ;;  %s204_s1 = inlined_call_operand.hbm [shape: f32[32,128], index: 1, kind: input, shape index: {}]   ;;  %s205_s2 = inlined_call_operand.hbm [shape: f32[2,128], index: 2, kind: output, shape index: {}]  }
   0x1   :  { %8 = vsyncpa [#allocation6], 0 }
   0x2   :  { %9 = vsyncpa [#allocation4], 0  ;;  %s171_s9 = smov [#allocation2]   ;;  %s172_s11 = smov [#allocation5]  }
   0x3   :  { %s16_s10 = sshll.u32 %s171_s9, 4  ;;  %s25_s12 = sshll.u32 %s172_s11, 4  ;;  %s17_s10 = int_to_ptr.vmem [resolvable:$true] %s16_s10  ;;  %s26_s12 = int_to_ptr.vmem [resolvable:$true] %s25_s12 }
   0x4   :  { %s113_s13 = scalar_lea.vmem %s17_s10, 32  ;;  %p118_p1 = scmp.lt.s32.totalorder %s17_s10, %s17_s10 }
   0x5   :  { %p114_p0 = scmp.ne.s32.totalorder %s17_s10, %s113_s13  ;;  %p119_p2 = scmp.lt.s32.totalorder %s113_s13, %s113_s13 }
   0x7   :  { %p120_p3 = por %p119_p2, %p118_p1 }
   0x9   :  { %p121_p4 = pnand %p120_p3, %p114_p0 }
   0xb   :  { %124 = shalt.err (!%p121_p4)
}
   0xc   :  { %19 = dma.hbm_to_vmem [thread:$0]  %s203_s0, 32, %s17_s10, [#allocation3]  }
   0xd   :  { %s133_s16 = scalar_lea.vmem %s26_s12, 512  ;;  %p138_p6 = scmp.lt.s32.totalorder %s26_s12, %s26_s12 }
   0xe   :  { %p134_p5 = scmp.ne.s32.totalorder %s26_s12, %s133_s16  ;;  %p139_p7 = scmp.lt.s32.totalorder %s133_s16, %s133_s16 }
  0x10   :  { %p140_p8 = por %p139_p7, %p138_p6 }
  0x12   :  { %p141_p9 = pnand %p140_p8, %p134_p5 }
  0x14   :  { %144 = shalt.err (!%p141_p9)
}
  0x15   :  { %s173_s17 = smov 128   ;;  %s174_s18 = smov 8  }
  0x16   :  { %31 = dma.hbm_to_vmem [thread:$0]  %s204_s1, 512, %s26_s12, [#allocation6], %s173_s17, %s173_s17, %s174_s18  }
  0x17   :  { %165 = dma.done.wait [#allocation3], 32  }
  0x18   :  { %166 = vsyncadd [#allocation3], 4294967264 }
  0x19   :  { %167 = dma.done.wait [#allocation6], 512  }
  0x1a   :  { %168 = vsyncadd [#allocation6], 4294966784  ;;  %vm39_vm0 = vcmask 1041408   ;;  %v38_v0 = vld [vmem:[#allocation2] sm:$0x3]  ;;  %v47_v7 = vld [vmem:[#allocation5] sm:$0xff]  ;;  %v73_v30 = vlaneseq }
  0x1b   :  { %v40_v1 = vsel %vm39_vm0, %v38_v0, 0.0  ;;  %v49_v11 = vld [vmem:[#allocation5 + $0x10] sm:$0xff]  ;;  %v48_v15 = vld [vmem:[#allocation5 + $0x8] sm:$0xff]  ;;  %v50_v24 = vld [vmem:[#allocation5 + $0x18] sm:$0xff]  ;;  %s175_s0 = smov [#allocation7]  }
  0x1c   :  { %v41_v2 = vrot.slane %v40_v1, 4  ;;  %v74_v31 = vshrl.u32 %v73_v30, 7  ;;  %s85_s1 = sshll.u32 %s175_s0, 4  ;;  %s86_s1 = int_to_ptr.vmem [resolvable:$true] %s85_s1 }
  0x1d   :  { %s145_s21 = scalar_lea.vmem %s86_s1, 32  ;;  %p150_p11 = scmp.lt.s32.totalorder %s86_s1, %s86_s1 }
  0x1e   :  { %v42_v3 = vadd.f32 %v41_v2, %v40_v1  ;;  %v75_v32 = vsub.s32 0, %v74_v31  ;;  %p146_p10 = scmp.ne.s32.totalorder %s86_s1, %s145_s21  ;;  %p151_p12 = scmp.lt.s32.totalorder %s145_s21, %s145_s21 }
  0x20   :  { %v43_v4 = vrot.slane %v42_v3, 2  ;;  %p152_p13 = por %p151_p12, %p150_p11 }
  0x22   :  { %v44_v5 = vadd.f32 %v43_v4, %v42_v3  ;;  %p153_p0 = pnand %p152_p13, %p146_p10 }
  0x24   :  { %v45_v6 = vrot.slane %v44_v5, 1 }
  0x26   :  { %v46_v8 = vadd.f32 %v45_v6, %v44_v5 }
  0x28   :  { %v51_v9 = vmul.f32 %v47_v7, %v46_v8 }
  0x2a   :  { %v52_v10 = vsel %vm39_vm0, %v51_v9, 0.0 }
  0x2b   :  { %53 = vadd.xlane.f32.xlu0 %v52_v10 }
  0xb4   :  { %v54_v12 = vpop.xlane.xlu0 %53 }
  0xb5   :  { %v55_v13 = vmul.f32 0.125, %v54_v12 }
  0xb7   :  { %v56_v14 = vadd.f32 %v55_v13, %v49_v11 }
  0xb9   :  { %v57_v16 = vmax.f32 %v56_v14, 0.0 }
  0xbb   :  { %v58_v17 = vmul.f32 %v57_v16, %v48_v15 }
  0xbd   :  { %v59_v18 = vsel %vm39_vm0, %v58_v17, 0.0 }
  0xbe   :  { %v60_v19 = vrot.slane %v59_v18, 4 }
  0xc0   :  { %v61_v20 = vadd.f32 %v60_v19, %v59_v18 }
  0xc2   :  { %v62_v21 = vrot.slane %v61_v20, 2 }
  0xc4   :  { %v63_v22 = vadd.f32 %v62_v21, %v61_v20 }
  0xc6   :  { %v64_v23 = vrot.slane %v63_v22, 1 }
  0xc8   :  { %v65_v25 = vadd.f32 %v64_v23, %v63_v22 }
  0xca   :  { %v66_v26 = vadd.f32 %v65_v25, %v50_v24 }
  0xcc   :  { %v95_v27 = vmul.f32 -1.442695, %v66_v26 }
  0xce   :  { %101 = vpow2.f32 %v95_v27 }
  0xdb   :  { %v102_v28 = vpop.eup %101 }
  0xdc   :  { %v70_v29 = vadd.f32 1.0, %v102_v28 }
  0xde   :  { %103 = vrcp.f32 %v70_v29 }
  0xeb   :  { %v104_v33 = vpop.eup %103 }
  0xec   :  { %v76_v34 = vrot.slane %v104_v33, %v75_v32 }
  0xee   :  { %v77_v35 = vmul.f32 %v76_v34, %v38_v0 }
  0xf0   :  { %78 = vst [vmem:[#allocation7] sm:$0x3] %v77_v35 }
  0xf1   :  { %156 = shalt.err (!%p153_p0)
}
  0xf2   :  { %88 = dma.vmem_to_hbm [thread:$0]  %s86_s1, 32, %s205_s2, [#allocation4]  }
  0xf3   :  { %169 = dma.done.wait [#allocation4], 32  }
  0xf4   :  { %170 = vsyncadd [#allocation4], 4294967264 }
  0xf5   :  { %92 = vsyncpa [#allocation3], 1 }
  0xf6   :  { %93 = vsyncpa [#allocation6], 1 }
  0xf7   :  { %94 = vsyncpa [#allocation4], 1 }

</bundles_post_ra>
